<compile_context>
chip_gen: v5e
topology: v5e:2x2
jax: 0.10.0
libtpu: 0.0.40
codegen_flags: <defaults>
</compile_context>

<pallas_src>
import numpy as np
import jax
import jax.numpy as jnp
from jax import lax
from jax.experimental import pallas as pl
from jax.experimental.pallas import tpu as pltpu


TF_SCH = 0  # module-level teacher-forcing schedule counter (as in the reference)

_VMEM_SPEC = pl.BlockSpec(memory_space=pltpu.MemorySpace.VMEM)


# ----------------------------------------------------------------------------
# Pallas kernels
# ----------------------------------------------------------------------------
def _linear_kernel(x_ref, w_ref, b_ref, o_ref):
    # y = x @ W + b     (x: [M,K] f32, W: [K,N] bf16, b: [1,N] f32)
    o_ref[...] = (
        jnp.dot(x_ref[...].astype(jnp.bfloat16), w_ref[...],
                preferred_element_type=jnp.float32)
        + b_ref[...]
    )


def linear(x, w, b):
    """x: (M, K) f32, w: (K, N) bf16, b: (1, N) f32 -> (M, N) f32 (fits VMEM)."""
    M = x.shape[0]
    N = w.shape[1]
    return pl.pallas_call(
        _linear_kernel,
        out_shape=jax.ShapeDtypeStruct((M, N), jnp.float32),
        in_specs=[_VMEM_SPEC, _VMEM_SPEC, _VMEM_SPEC],
        out_specs=_VMEM_SPEC,
    )(x, w, b)


def _gate_math(gates, c_prev):
    """PyTorch LSTM gate math, gate order (i, f, g, o)."""
    H = c_prev.shape[-1]
    i = jax.nn.sigmoid(gates[:, 0 * H:1 * H])
    f = jax.nn.sigmoid(gates[:, 1 * H:2 * H])
    g = jnp.tanh(gates[:, 2 * H:3 * H])
    o = jax.nn.sigmoid(gates[:, 3 * H:4 * H])
    c_new = f * c_prev + i * g
    h_new = o * jnp.tanh(c_new)
    return h_new, c_new


def _bilstm_scan_kernel(xg_ref, whh_ref, hs_ref, h_sc, c_sc):
    """One (direction, time) step of a fused bidirectional LSTM layer.

    xg_ref : (1, 1, B, 4H) precomputed x@Wih + b for this (dir, t)
    whh_ref: (1, H, 4H)    resident recurrent weights (bf16)
    hs_ref : (1, 1, B, H)  output hidden state for this (dir, t)
    h_sc/c_sc: (B, H) f32  carried state in VMEM scratch
    """
    t = pl.program_id(1)

    @pl.when(t == 0)
    def _():
        h_sc[...] = jnp.zeros_like(h_sc)
        c_sc[...] = jnp.zeros_like(c_sc)

    gates = xg_ref[0, 0] + jnp.dot(
        h_sc[...].astype(jnp.bfloat16), whh_ref[0],
        preferred_element_type=jnp.float32)
    h_new, c_new = _gate_math(gates, c_sc[...])
    h_sc[...] = h_new
    c_sc[...] = c_new
    hs_ref[0, 0] = h_new


def _bilstm_scan(xg, whh):
    """xg: (2, T, B, 4H) f32 (dir 0 fwd, dir 1 bwd), whh: (2, H, 4H) bf16
    -> hs: (2, T, B, H) f32, both directions in forward time order."""
    _, T, B, G = xg.shape
    H = whh.shape[1]

    def io_idx(d, t):
        # forward direction walks t, backward direction walks T-1-t; the
        # backward outputs are therefore already stored in forward time order.
        return (d, d * (T - 1 - t) + (1 - d) * t, 0, 0)

    return pl.pallas_call(
        _bilstm_scan_kernel,
        out_shape=jax.ShapeDtypeStruct((2, T, B, H), jnp.float32),
        grid_spec=pltpu.PrefetchScalarGridSpec(
            num_scalar_prefetch=0,
            grid=(2, T),
            in_specs=[
                pl.BlockSpec((1, 1, B, G), io_idx),
                pl.BlockSpec((1, H, G), lambda d, t: (d, 0, 0)),  # resident Whh
            ],
            out_specs=pl.BlockSpec((1, 1, B, H), io_idx),
            scratch_shapes=[pltpu.VMEM((B, H), jnp.float32),
                            pltpu.VMEM((B, H), jnp.float32)],
        ),
        compiler_params=pltpu.CompilerParams(
            dimension_semantics=("parallel", "arbitrary")),
    )(xg, whh)


def _decoder_step_kernel(tf_ref, emb_ref, val_ref, etf_ref, gum_ref,
                         w1i_ref, w1h_ref, b1_ref,
                         w2i_ref, w2h_ref, b2_ref,
                         wcp_ref, bcp_ref,
                         out_ref,
                         h1_sc, c1_sc, h2_sc, c2_sc, pred_sc):
    """One decoder time step: char-embed select -> LSTMCell x2 -> char logits."""
    i = pl.program_id(0)
    B, _ = h1_sc.shape
    Vp = pred_sc.shape[1]
    col = lax.broadcasted_iota(jnp.int32, (B, Vp), 1)

    @pl.when(i == 0)
    def _():
        h1_sc[...] = jnp.zeros_like(h1_sc)
        c1_sc[...] = jnp.zeros_like(c1_sc)
        h2_sc[...] = jnp.zeros_like(h2_sc)
        c2_sc[...] = jnp.zeros_like(c2_sc)
        # The reference starts from a (B, 1) logit whose argmax is always 0
        # (the padding embedding); force argmax == 0 at step 0.
        pred_sc[...] = jnp.where(col == 0, 1e9, -1e9).astype(jnp.float32)

    # --- model-fed branch: argmax(gumbel_softmax(prediction)) -> embedding ---
    # argmax(softmax((x+g)/tau)) == argmax(x+g); padded vocab columns carry a
    # -1e9 bias so they can never win.
    z = pred_sc[...] + gum_ref[0]
    zmax = jnp.max(z, axis=-1, keepdims=True)
    idx = jnp.min(jnp.where(z == zmax, col, Vp), axis=-1, keepdims=True)
    onehot = (col == idx).astype(jnp.bfloat16)
    ce_model = jnp.dot(onehot, emb_ref[...], preferred_element_type=jnp.float32)

    # --- teacher-forcing select (per-step decision prefetched into SMEM) ---
    use_model = (tf_ref[i] == 1).astype(jnp.float32)
    char_embed = use_model * ce_model + (1.0 - use_model) * etf_ref[0]

    v = val_ref[0]
    inp = jnp.concatenate([char_embed, v], axis=1).astype(jnp.bfloat16)

    g1 = (jnp.dot(inp, w1i_ref[...], preferred_element_type=jnp.float32)
          + jnp.dot(h1_sc[...].astype(jnp.bfloat16), w1h_ref[...],
                    preferred_element_type=jnp.float32)
          + b1_ref[...])
    h1, c1 = _gate_math(g1, c1_sc[...])

    g2 = (jnp.dot(h1.astype(jnp.bfloat16), w2i_ref[...],
                  preferred_element_type=jnp.float32)
          + jnp.dot(h2_sc[...].astype(jnp.bfloat16), w2h_ref[...],
                    preferred_element_type=jnp.float32)
          + b2_ref[...])
    h2, c2 = _gate_math(g2, c2_sc[...])

    h1_sc[...] = h1
    c1_sc[...] = c1
    h2_sc[...] = h2
    c2_sc[...] = c2

    logits = (jnp.dot(jnp.concatenate([h2, v], axis=1).astype(jnp.bfloat16),
                      wcp_ref[...], preferred_element_type=jnp.float32)
              + bcp_ref[...])
    pred_sc[...] = logits
    out_ref[0] = logits


# ----------------------------------------------------------------------------
# Layers built on the Pallas kernels
# ----------------------------------------------------------------------------
def bilstm(xs, lp):
    """Bidirectional LSTM layer: (T, B, In) -> (T, B, 2H) = concat[fwd, bwd]."""
    T, B, In = xs.shape
    flat = xs.reshape(T * B, In)
    # Hoisted whole-sequence input projections (one big matmul per direction).
    xg_f = linear(flat, lp["wih_f"], lp["b_f"]).reshape(T, B, -1)
    xg_b = linear(flat, lp["wih_b"], lp["b_b"]).reshape(T, B, -1)
    xg = jnp.stack([xg_f, xg_b], axis=0)        # (2, T, B, 4H)
    hs = _bilstm_scan(xg, lp["whh"])            # (2, T, B, H)
    return jnp.concatenate([hs[0], hs[1]], axis=-1)


def concat_pblstm(x):
    """(L, B, D) -> (L//2, B, 2D): concatenate adjacent time steps (pBLSTM)."""
    L, B, D = x.shape
    if L % 2 != 0:
        x = x[:-1]
        L -= 1
    x = jnp.transpose(x, (1, 0, 2)).reshape(B, L // 2, 2 * D)
    return jnp.transpose(x, (1, 0, 2))


# ----------------------------------------------------------------------------
# Encoder / Decoder / Seq2Seq forward
# ----------------------------------------------------------------------------
def encoder_forward(p, speech):
    B, T, _ = speech.shape
    x = linear(speech.reshape(B * T, -1), p["lin1_w"], p["lin1_b"])
    out = jnp.transpose(x.reshape(B, T, 128), (1, 0, 2))   # (T, B, 128) time-major
    out = bilstm(out, p["lstm"])                            # (T, B, 512)
    for name in ("pb1", "pb2", "pb3"):
        out = concat_pblstm(out)                            # halve T, double D
        out = bilstm(out, p[name])
    Tn, Bn, D = out.shape                                   # (T/8, B, 2*hidden_dim)
    flat = out.reshape(Tn * Bn, D)
    keys = linear(flat, p["key_w"], p["key_b"]).reshape(Tn, Bn, -1)
    vals = linear(flat, p["val_w"], p["val_b"]).reshape(Tn, Bn, -1)
    return keys, vals


def decoder_forward(p, keys, values, lens, text, is_train=True):
    # isAttended=False path of the reference Decoder, fused over max_len steps.
    global TF_SCH
    Tn, B, Vs = values.shape
    emb = p["emb_pad"]                     # (Vp, hidden_dim) bf16, lane-padded vocab
    Vp, Hd = emb.shape
    Kd = p["l2"]["whh"].shape[0]

    if is_train:
        max_len = text.shape[1]
        etf = jnp.transpose(emb[text].astype(jnp.float32), (1, 0, 2))  # (L, B, Hd)
        gumbel = jax.random.gumbel(jax.random.PRNGKey(42), (max_len, B, Vp),
                                   jnp.float32)
    else:
        # TODO(synk): reference uses max_len=250 in eval; the non-attended path
        #             indexes values[i], so clamp to the encoder length here.
        max_len = min(250, Tn)
        etf = jnp.zeros((max_len, B, Hd), jnp.float32)
        gumbel = jnp.zeros((max_len, B, Vp), jnp.float32)

    # Teacher-forcing schedule (host-side RNG, as in the reference).
    tf_rate = max(0.9 ** TF_SCH, 0.6)
    TF_SCH += 1
    rng = np.random.RandomState(0)
    if is_train:
        tf_mask = np.asarray(rng.uniform(size=max_len) > tf_rate, dtype=np.int32)
    else:
        tf_mask = np.ones(max_len, dtype=np.int32)
    tf_mask = jnp.asarray(tf_mask)

    l1, l2 = p["l1"], p["l2"]
    const2 = lambda i, tf: (0, 0)
    step3 = lambda i, tf: (i, 0, 0)

    preds = pl.pallas_call(
        _decoder_step_kernel,
        out_shape=jax.ShapeDtypeStruct((max_len, B, Vp), jnp.float32),
        grid_spec=pltpu.PrefetchScalarGridSpec(
            num_scalar_prefetch=1,                 # tf_mask -> SMEM
            grid=(max_len,),
            in_specs=[
                pl.BlockSpec(emb.shape, const2),           # embedding table (resident)
                pl.BlockSpec((1, B, Vs), step3),           # values[i]
                pl.BlockSpec((1, B, Hd), step3),           # teacher-forced embeddings
                pl.BlockSpec((1, B, Vp), step3),           # gumbel noise
                pl.BlockSpec(l1["wih"].shape, const2),     # resident decoder weights
                pl.BlockSpec(l1["whh"].shape, const2),
                pl.BlockSpec(l1["b"].shape, const2),
                pl.BlockSpec(l2["wih"].shape, const2),
                pl.BlockSpec(l2["whh"].shape, const2),
                pl.BlockSpec(l2["b"].shape, const2),
                pl.BlockSpec(p["cp_w"].shape, const2),
                pl.BlockSpec(p["cp_b"].shape, const2),
            ],
            out_specs=pl.BlockSpec((1, B, Vp), step3),     # lane-dense (Vp=128) logits
            scratch_shapes=[
                pltpu.VMEM((B, Hd), jnp.float32), pltpu.VMEM((B, Hd), jnp.float32),
                pltpu.VMEM((B, Kd), jnp.float32), pltpu.VMEM((B, Kd), jnp.float32),
                pltpu.VMEM((B, Vp), jnp.float32),
            ],
        ),
        compiler_params=pltpu.CompilerParams(dimension_semantics=("arbitrary",)),
    )(tf_mask, emb, values, etf, gumbel,
      l1["wih"], l1["whh"], l1["b"], l2["wih"], l2["whh"], l2["b"],
      p["cp_w"], p["cp_b"])

    return jnp.transpose(preds, (1, 0, 2))                  # (B, max_len, Vp)


def seq2seq_forward(p, speech_input, speech_len, text_input=None, is_train=True):
    B = speech_input.shape[0]
    Bp = ((B + 7) // 8) * 8                                  # sublane-pad the batch
    if Bp != B:
        speech_input = jnp.pad(speech_input, ((0, Bp - B), (0, 0), (0, 0)))
        if text_input is not None:
            text_input = jnp.pad(text_input, ((0, Bp - B), (0, 0)))
    keys, values = encoder_forward(p, speech_input)          # TODO(synk): speech_len mask
    preds = decoder_forward(p, keys, values, speech_len, text_input, is_train=is_train)
    return preds[:B, :, :p["vocab_size"]]


# ----------------------------------------------------------------------------
# Deterministic parameter init (shapes from the nn.Module __init__s)
# ----------------------------------------------------------------------------
def init_params(key, input_dim, hidden_dim, vocab_size, value_size=128, key_size=128):
    keys = iter(jax.random.split(key, 64))

    def w(shape, scale=0.08, dtype=jnp.bfloat16):
        return (scale * jax.random.normal(next(keys), shape, jnp.float32)).astype(dtype)

    def bilstm_p(in_dim, h):
        # combined bias (b_ih + b_hh), gate order (i, f, g, o); whh stacked (fwd, bwd)
        return {"wih_f": w((in_dim, 4 * h)), "b_f": w((1, 4 * h), dtype=jnp.float32),
                "wih_b": w((in_dim, 4 * h)), "b_b": w((1, 4 * h), dtype=jnp.float32),
                "whh": w((2, h, 4 * h))}

    def cell_p(in_dim, h):
        return {"wih": w((in_dim, 4 * h)), "whh": w((h, 4 * h)),
                "b": w((1, 4 * h), dtype=jnp.float32)}

    assert vocab_size <= 128
    Vp = 128                                                 # lane-padded vocab

    p = {}
    # Encoder
    p["lin1_w"] = w((input_dim, 128)); p["lin1_b"] = w((1, 128), dtype=jnp.float32)
    p["lstm"] = bilstm_p(128, 256)
    p["pb1"] = bilstm_p(1024, 256)
    p["pb2"] = bilstm_p(1024, 256)
    p["pb3"] = bilstm_p(1024, hidden_dim)
    p["key_w"] = w((2 * hidden_dim, value_size)); p["key_b"] = w((1, value_size), dtype=jnp.float32)
    p["val_w"] = w((2 * hidden_dim, key_size));   p["val_b"] = w((1, key_size), dtype=jnp.float32)
    # Decoder
    emb = w((vocab_size, hidden_dim), dtype=jnp.float32).at[0].set(0.0)  # padding_idx=0
    p["emb_pad"] = (jnp.zeros((Vp, hidden_dim), jnp.bfloat16)
                    .at[:vocab_size].set(emb.astype(jnp.bfloat16)))
    p["l1"] = cell_p(hidden_dim + value_size, hidden_dim)
    p["l2"] = cell_p(hidden_dim, key_size)
    cp_w = w((key_size + value_size, vocab_size), dtype=jnp.float32)
    cp_b = w((1, vocab_size), dtype=jnp.float32)
    # Lane-pad the classification head; padded columns get a -1e9 bias so they
    # can never win the (gumbel) argmax, and are sliced off before returning.
    p["cp_w"] = (jnp.zeros((key_size + value_size, Vp), jnp.bfloat16)
                 .at[:, :vocab_size].set(cp_w.astype(jnp.bfloat16)))
    p["cp_b"] = jnp.full((1, Vp), -1e9, jnp.float32).at[:, :vocab_size].set(cp_b)
    p["vocab_size"] = vocab_size
    return p


# ----------------------------------------------------------------------------
if __name__ == "__main__":
    B, T, INPUT_DIM, HIDDEN_DIM, VOCAB, TEXT_LEN = 2, 64, 64, 128, 32, 8
    # Decoder (isAttended=False) indexes values[i] for i < text_len, so
    # text_len must be <= T // 8 (three pBLSTM time halvings).
    assert TEXT_LEN <= T // 8

    root = jax.random.PRNGKey(0)
    k_speech, k_text, k_param = jax.random.split(root, 3)

    speech_input = jax.random.normal(k_speech, (B, T, INPUT_DIM), jnp.float32)
    speech_len = jnp.full((B,), T, dtype=jnp.int32)       # full lengths (see TODO)
    text_input = jax.random.randint(k_text, (B, TEXT_LEN), 1, VOCAB, dtype=jnp.int32)

    params = init_params(k_param, INPUT_DIM, HIDDEN_DIM, VOCAB)

    out = seq2seq_forward(params, speech_input, speech_len, text_input, is_train=True)
    out = jax.block_until_ready(out)

    assert out.shape == (B, TEXT_LEN, VOCAB), out.shape
    assert bool(jnp.all(jnp.isfinite(out)))
    print("KERNEL_OK")
</pallas_src>

<mosaic_0001>
module attributes {stable_mosaic.version = 11 : i64} {
  func.func @_linear_kernel(%arg0: memref<512x64xf32, #tpu.memory_space<vmem>>, %arg1: memref<64x128xbf16, #tpu.memory_space<vmem>>, %arg2: memref<1x128xf32, #tpu.memory_space<vmem>>, %arg3: memref<512x128xf32, #tpu.memory_space<vmem>>) attributes {dimension_semantics = [], scalar_prefetch = 0 : i64, scratch_operands = 0 : i64, tpu.core_type = #tpu.core_type<tc>} {
    %c0 = arith.constant 0 : index
    %c0_0 = arith.constant 0 : index
    %0 = vector.load %arg0[%c0, %c0_0] : memref<512x64xf32, #tpu.memory_space<vmem>>, vector<512x64xf32>
    %1 = arith.truncf %0 : vector<512x64xf32> to vector<512x64xbf16>
    %c0_1 = arith.constant 0 : index
    %c0_2 = arith.constant 0 : index
    %2 = vector.load %arg1[%c0_1, %c0_2] : memref<64x128xbf16, #tpu.memory_space<vmem>>, vector<64x128xbf16>
    %cst = arith.constant dense<0.000000e+00> : vector<512x128xf32>
    %3 = tpu.matmul %1, %2, %cst {dimension_numbers = #tpu.dot_dimension_numbers<[1], [0], [0], [1], [0, 0, 1, 1], [], []>} : vector<512x64xbf16>, vector<64x128xbf16>, vector<512x128xf32> -> vector<512x128xf32>
    %c0_3 = arith.constant 0 : index
    %c0_4 = arith.constant 0 : index
    %4 = vector.load %arg2[%c0_3, %c0_4] : memref<1x128xf32, #tpu.memory_space<vmem>>, vector<1x128xf32>
    %5 = vector.broadcast %4 : vector<1x128xf32> to vector<512x128xf32>
    %6 = arith.addf %3, %5 : vector<512x128xf32>
    %c0_5 = arith.constant 0 : index
    %c0_6 = arith.constant 0 : index
    %7 = vector.load %arg3[%c0_5, %c0_6] : memref<512x128xf32, #tpu.memory_space<vmem>>, vector<512x128xf32>
    tpu.vector_store %arg3[%c0_5, %c0_6], %6 {strides = array<i32>} : memref<512x128xf32, #tpu.memory_space<vmem>>, vector<512x128xf32>,
    return
  }
}

</mosaic_0001>

<bundles_post_ra>
// kernel: tpu_custom_call.1
= control target key start
LH: loop header
LB: loop body
LE: loop exit
PB: predicated region body
PF: predicated region fallthrough
CT: control target
= control target key end

     0   :  { %s921_s0 = inlined_call_operand.vmem [shape: f32[512,64], index: 0, kind: input, shape index: {}]   ;;  %s922_s1 = inlined_call_operand.vmem [shape: bf16[64,128], index: 1, kind: input, shape index: {}]   ;;  %s923_s2 = inlined_call_operand.vmem [shape: f32[1,128], index: 2, kind: input, shape index: {}]   ;;  %s924_s3 = inlined_call_operand.hbm [shape: f32[512,128], index: 3, kind: output, shape index: {}]  }
   0x1   :  { %v547_v0 = vld [vmem:[%s922_s1 + $0x18] sm:$0xff]  ;;  %v546_v1 = vld [vmem:[%s922_s1 + $0x10] sm:$0xff]  ;;  %v545_v2 = vld [vmem:[%s922_s1 + $0x8] sm:$0xff] }
   0x2   :  { %249 = vmatpush.bf16.msra.mxu0 %v547_v0  ;;  %548 = vmatpush.bf16.msra.mxu1 %v547_v0 }
   0x3   :  { %549 = vmatpush.bf16.msra.mxu2 %v547_v0  ;;  %550 = vmatpush.bf16.msra.mxu3 %v547_v0 }
   0x6   :  { %250 = vmatpush.bf16.msra.mxu0 %v546_v1  ;;  %551 = vmatpush.bf16.msra.mxu1 %v546_v1 }
   0x7   :  { %552 = vmatpush.bf16.msra.mxu2 %v546_v1  ;;  %553 = vmatpush.bf16.msra.mxu3 %v546_v1 }
   0x8   :  { %8 = vsyncpa [#allocation3], 0  ;;  %v544_v3 = vld [vmem:[%s922_s1] sm:$0xff]  ;;  %v17_v5 = vld [vmem:[%s921_s0 + $0x8] sm:$0xff]  ;;  %vm148_vm0 = vcmask 523264   ;;  %s484_s12 = sshll.u32 %s924_s3, 4  ;;  %s485_s12 = int_to_ptr.hbm [resolvable:$true] %s484_s12 }
   0x9   :  { %v16_v4 = vld [vmem:[%s921_s0] sm:$0xff]  ;;  %v33_v7 = vld [vmem:[%s921_s0 + $0x88] sm:$0xff]  ;;  %v18_v16 = vld [vmem:[%s921_s0 + $0x10] sm:$0xff]  ;;  %s591_s13 = smov 128   ;;  %s592_s14 = smov 8  }
   0xa   :  { %251 = vmatpush.bf16.msra.mxu0 %v545_v2  ;;  %554 = vmatpush.bf16.msra.mxu1 %v545_v2  ;;  %v32_v6 = vld [vmem:[%s921_s0 + $0x80] sm:$0xff]  ;;  %v49_v9 = vld [vmem:[%s921_s0 + $0x108] sm:$0xff]  ;;  %v80_v12 = vpack.c.bf16 %v17_v5, %v16_v4  ;;  %v19_v17 = vld [vmem:[%s921_s0 + $0x18] sm:$0xff] }
   0xb   :  { %v48_v8 = vld [vmem:[%s921_s0 + $0x100] sm:$0xff]  ;;  %555 = vmatpush.bf16.msra.mxu2 %v545_v2  ;;  %556 = vmatpush.bf16.msra.mxu3 %v545_v2  ;;  %v65_v11 = vld [vmem:[%s921_s0 + $0x188] sm:$0xff]  ;;  %v88_v13 = vpack.c.bf16 %v33_v7, %v32_v6  ;;  %v34_v18 = vld [vmem:[%s921_s0 + $0x90] sm:$0xff]  ;;  %v81_v24 = vpack.c.bf16 %v19_v17, %v18_v16 }
   0xc   :  { %v64_v10 = vld [vmem:[%s921_s0 + $0x180] sm:$0xff]  ;;  %v96_v14 = vpack.c.bf16 %v49_v9, %v48_v8  ;;  %v35_v19 = vld [vmem:[%s921_s0 + $0x98] sm:$0xff]  ;;  %v50_v20 = vld [vmem:[%s921_s0 + $0x110] sm:$0xff] }
   0xd   :  { %v104_v15 = vpack.c.bf16 %v65_v11, %v64_v10  ;;  %v51_v21 = vld [vmem:[%s921_s0 + $0x118] sm:$0xff]  ;;  %v66_v22 = vld [vmem:[%s921_s0 + $0x190] sm:$0xff]  ;;  %v89_v25 = vpack.c.bf16 %v35_v19, %v34_v18  ;;  %v20_v28 = vld [vmem:[%s921_s0 + $0x20] sm:$0xff] }
   0xe   :  { %252 = vmatpush.bf16.msra.mxu0 %v544_v3  ;;  %557 = vmatpush.bf16.msra.mxu1 %v544_v3  ;;  %v67_v23 = vld [vmem:[%s921_s0 + $0x198] sm:$0xff]  ;;  %v97_v26 = vpack.c.bf16 %v51_v21, %v50_v20  ;;  %v21_v29 = vld [vmem:[%s921_s0 + $0x28] sm:$0xff]  ;;  %v36_v30 = vld [vmem:[%s921_s0 + $0xa0] sm:$0xff] }
   0xf   :  { %558 = vmatpush.bf16.msra.mxu2 %v544_v3  ;;  %559 = vmatpush.bf16.msra.mxu3 %v544_v3  ;;  %v105_v27 = vpack.c.bf16 %v67_v23, %v66_v22  ;;  %v37_v31 = vld [vmem:[%s921_s0 + $0xa8] sm:$0xff]  ;;  %v52_v32 = vld [vmem:[%s921_s0 + $0x120] sm:$0xff]  ;;  %v82_v36 = vpack.c.bf16 %v21_v29, %v20_v28  ;;  %v22_v40 = vld [vmem:[%s921_s0 + $0x30] sm:$0xff] }
  0x10   :  { %v53_v33 = vld [vmem:[%s921_s0 + $0x128] sm:$0xff]  ;;  %v68_v34 = vld [vmem:[%s921_s0 + $0x1a0] sm:$0xff]  ;;  %v90_v37 = vpack.c.bf16 %v37_v31, %v36_v30  ;;  %v23_v41 = vld [vmem:[%s921_s0 + $0x38] sm:$0xff] }
  0x11   :  { %512 = vmatmul.msk.bf16.vlgmr.msra.gmra.mxu0 %vm148_vm0, %v80_v12  ;;  %520 = vmatmul.msk.bf16.vlgmr.msra.gmra.mxu1 %vm148_vm0, %v88_v13  ;;  %v69_v35 = vld [vmem:[%s921_s0 + $0x1a8] sm:$0xff]  ;;  %v98_v38 = vpack.c.bf16 %v53_v33, %v52_v32  ;;  %v38_v42 = vld [vmem:[%s921_s0 + $0xb0] sm:$0xff]  ;;  %v39_v43 = vld [vmem:[%s921_s0 + $0xb8] sm:$0xff]  ;;  %v83_v48 = vpack.c.bf16 %v23_v41, %v22_v40 }
  0x12   :  { %528 = vmatmul.msk.bf16.vlgmr.msra.gmra.mxu2 %vm148_vm0, %v96_v14  ;;  %536 = vmatmul.msk.bf16.vlgmr.msra.gmra.mxu3 %vm148_vm0, %v104_v15  ;;  %v106_v39 = vpack.c.bf16 %v69_v35, %v68_v34  ;;  %v54_v44 = vld [vmem:[%s921_s0 + $0x130] sm:$0xff]  ;;  %v55_v45 = vld [vmem:[%s921_s0 + $0x138] sm:$0xff]  ;;  %v91_v49 = vpack.c.bf16 %v39_v43, %v38_v42  ;;  %v24_v52 = vld [vmem:[%s921_s0 + $0x40] sm:$0xff] }
  0x13   :  { %v70_v46 = vld [vmem:[%s921_s0 + $0x1b0] sm:$0xff]  ;;  %v71_v47 = vld [vmem:[%s921_s0 + $0x1b8] sm:$0xff]  ;;  %v99_v50 = vpack.c.bf16 %v55_v45, %v54_v44  ;;  %v25_v53 = vld [vmem:[%s921_s0 + $0x48] sm:$0xff] }
  0x14   :  { %v107_v51 = vpack.c.bf16 %v71_v47, %v70_v46  ;;  %v40_v54 = vld [vmem:[%s921_s0 + $0xc0] sm:$0xff]  ;;  %v41_v55 = vld [vmem:[%s921_s0 + $0xc8] sm:$0xff]  ;;  %v84_v60 = vpack.c.bf16 %v25_v53, %v24_v52  ;;  %v26_v0 = vld [vmem:[%s921_s0 + $0x50] sm:$0xff] }
  0x15   :  { %v56_v56 = vld [vmem:[%s921_s0 + $0x140] sm:$0xff]  ;;  %v57_v57 = vld [vmem:[%s921_s0 + $0x148] sm:$0xff]  ;;  %v92_v61 = vpack.c.bf16 %v41_v55, %v40_v54  ;;  %v27_v1 = vld [vmem:[%s921_s0 + $0x58] sm:$0xff] }
  0x16   :  { %v72_v58 = vld [vmem:[%s921_s0 + $0x1c0] sm:$0xff]  ;;  %v73_v59 = vld [vmem:[%s921_s0 + $0x1c8] sm:$0xff]  ;;  %v100_v62 = vpack.c.bf16 %v57_v57, %v56_v56  ;;  %v42_v2 = vld [vmem:[%s921_s0 + $0xd0] sm:$0xff]  ;;  %v85_v8 = vpack.c.bf16 %v27_v1, %v26_v0 }
  0x17   :  { %v108_v63 = vpack.c.bf16 %v73_v59, %v72_v58  ;;  %v43_v3 = vld [vmem:[%s921_s0 + $0xd8] sm:$0xff]  ;;  %v58_v4 = vld [vmem:[%s921_s0 + $0x150] sm:$0xff]  ;;  %v28_v12 = vld [vmem:[%s921_s0 + $0x60] sm:$0xff] }
  0x18   :  { %v59_v5 = vld [vmem:[%s921_s0 + $0x158] sm:$0xff]  ;;  %v74_v6 = vld [vmem:[%s921_s0 + $0x1d0] sm:$0xff]  ;;  %v93_v9 = vpack.c.bf16 %v43_v3, %v42_v2  ;;  %v29_v13 = vld [vmem:[%s921_s0 + $0x68] sm:$0xff] }
  0x19   :  { %v75_v7 = vld [vmem:[%s921_s0 + $0x1d8] sm:$0xff]  ;;  %v101_v10 = vpack.c.bf16 %v59_v5, %v58_v4  ;;  %v44_v14 = vld [vmem:[%s921_s0 + $0xe0] sm:$0xff]  ;;  %v45_v15 = vld [vmem:[%s921_s0 + $0xe8] sm:$0xff]  ;;  %v86_v20 = vpack.c.bf16 %v29_v13, %v28_v12 }
  0x1a   :  { %v109_v11 = vpack.c.bf16 %v75_v7, %v74_v6  ;;  %v60_v16 = vld [vmem:[%s921_s0 + $0x160] sm:$0xff]  ;;  %v61_v17 = vld [vmem:[%s921_s0 + $0x168] sm:$0xff]  ;;  %v94_v21 = vpack.c.bf16 %v45_v15, %v44_v14  ;;  %v62_v28 = vld [vmem:[%s921_s0 + $0x170] sm:$0xff] }
  0x1b   :  { %v76_v18 = vld [vmem:[%s921_s0 + $0x1e0] sm:$0xff]  ;;  %v77_v19 = vld [vmem:[%s921_s0 + $0x1e8] sm:$0xff]  ;;  %v102_v22 = vpack.c.bf16 %v61_v17, %v60_v16  ;;  %v63_v29 = vld [vmem:[%s921_s0 + $0x178] sm:$0xff] }
  0x1c   :  { %v110_v23 = vpack.c.bf16 %v77_v19, %v76_v18  ;;  %v78_v30 = vld [vmem:[%s921_s0 + $0x1f0] sm:$0xff]  ;;  %v79_v31 = vld [vmem:[%s921_s0 + $0x1f8] sm:$0xff]  ;;  %v103_v34 = vpack.c.bf16 %v63_v29, %v62_v28 }
  0x1d   :  { %v111_v35 = vpack.c.bf16 %v79_v31, %v78_v30 }
  0x21   :  { %513 = vmatmul.msk.bf16.gmra.mxu0 %vm148_vm0, %v81_v24  ;;  %521 = vmatmul.msk.bf16.gmra.mxu1 %vm148_vm0, %v89_v25  ;;  %v30_v24 = vld [vmem:[%s921_s0 + $0x70] sm:$0xff]  ;;  %v31_v25 = vld [vmem:[%s921_s0 + $0x78] sm:$0xff] }
  0x22   :  { %529 = vmatmul.msk.bf16.gmra.mxu2 %vm148_vm0, %v97_v26  ;;  %537 = vmatmul.msk.bf16.gmra.mxu3 %vm148_vm0, %v105_v27  ;;  %v46_v26 = vld [vmem:[%s921_s0 + $0xf0] sm:$0xff]  ;;  %v47_v27 = vld [vmem:[%s921_s0 + $0xf8] sm:$0xff]  ;;  %v87_v32 = vpack.c.bf16 %v31_v25, %v30_v24  ;;  %s590_s0 = smov [#allocation2]  }
  0x23   :  { %v95_v33 = vpack.c.bf16 %v47_v27, %v46_v26 }
  0x31   :  { %514 = vmatmul.msk.bf16.gmra.mxu0 %vm148_vm0, %v82_v36  ;;  %522 = vmatmul.msk.bf16.gmra.mxu1 %vm148_vm0, %v90_v37  ;;  %v852_v36 = vld [vmem:[%s923_s2] ss:$0 sm:$0xff]  ;;  %s482_s2 = sshll.u32 %s590_s0, 4  ;;  %s483_s2 = int_to_ptr.vmem [resolvable:$true] %s482_s2 }
  0x32   :  { %530 = vmatmul.msk.bf16.gmra.mxu2 %vm148_vm0, %v98_v38  ;;  %538 = vmatmul.msk.bf16.gmra.mxu3 %vm148_vm0, %v106_v39 }
  0x41   :  { %515 = vmatmul.msk.bf16.gmra.mxu0 %vm148_vm0, %v83_v48  ;;  %523 = vmatmul.msk.bf16.gmra.mxu1 %vm148_vm0, %v91_v49 }
  0x42   :  { %531 = vmatmul.msk.bf16.gmra.mxu2 %vm148_vm0, %v99_v50  ;;  %539 = vmatmul.msk.bf16.gmra.mxu3 %vm148_vm0, %v107_v51 }
  0x51   :  { %516 = vmatmul.msk.bf16.gmra.mxu0 %vm148_vm0, %v84_v60  ;;  %524 = vmatmul.msk.bf16.gmra.mxu1 %vm148_vm0, %v92_v61 }
  0x52   :  { %532 = vmatmul.msk.bf16.gmra.mxu2 %vm148_vm0, %v100_v62  ;;  %540 = vmatmul.msk.bf16.gmra.mxu3 %vm148_vm0, %v108_v63 }
  0x61   :  { %517 = vmatmul.msk.bf16.gmra.mxu0 %vm148_vm0, %v85_v8  ;;  %525 = vmatmul.msk.bf16.gmra.mxu1 %vm148_vm0, %v93_v9 }
  0x62   :  { %533 = vmatmul.msk.bf16.gmra.mxu2 %vm148_vm0, %v101_v10  ;;  %541 = vmatmul.msk.bf16.gmra.mxu3 %vm148_vm0, %v109_v11 }
  0x71   :  { %518 = vmatmul.msk.bf16.gmra.mxu0 %vm148_vm0, %v86_v20  ;;  %526 = vmatmul.msk.bf16.gmra.mxu1 %vm148_vm0, %v94_v21 }
  0x72   :  { %534 = vmatmul.msk.bf16.gmra.mxu2 %vm148_vm0, %v102_v22  ;;  %542 = vmatmul.msk.bf16.gmra.mxu3 %vm148_vm0, %v110_v23 }
  0x81   :  { %519 = vmatmul.msk.bf16.gmra.mxu0 %vm148_vm0, %v87_v32  ;;  %527 = vmatmul.msk.bf16.gmra.mxu1 %vm148_vm0, %v95_v33 }
  0x82   :  { %535 = vmatmul.msk.bf16.gmra.mxu2 %vm148_vm0, %v103_v34  ;;  %543 = vmatmul.msk.bf16.gmra.mxu3 %vm148_vm0, %v111_v35 }
  0x8e   :  { %v254_v37 = vpop.f32.mrf.mxu0  ;;  %v294_v38 = vpop.f32.mrf.mxu1 }
  0x8f   :  { %v255_v39 = vadd.f32 %v852_v36, %v254_v37  ;;  %v295_v40 = vadd.f32 %v852_v36, %v294_v38 }
  0x91   :  { %414 = vst [vmem:[#allocation2] sm:$0xff] %v255_v39 }
  0x92   :  { %430 = vst [vmem:[#allocation2 + $0x80] sm:$0xff] %v295_v40 }
  0x95   :  { %v334_v41 = vpop.f32.mrf.mxu2  ;;  %v374_v42 = vpop.f32.mrf.mxu3 }
  0x96   :  { %v335_v43 = vadd.f32 %v852_v36, %v334_v41  ;;  %v375_v44 = vadd.f32 %v852_v36, %v374_v42  ;;  %v256_v45 = vpop.f32.mrf.mxu0  ;;  %v296_v46 = vpop.f32.mrf.mxu1 }
  0x97   :  { %v257_v47 = vadd.f32 %v852_v36, %v256_v45  ;;  %v297_v48 = vadd.f32 %v852_v36, %v296_v46 }
  0x98   :  { %446 = vst [vmem:[#allocation2 + $0x100] sm:$0xff] %v335_v43 }
  0x99   :  { %462 = vst [vmem:[#allocation2 + $0x180] sm:$0xff] %v375_v44 }
  0x9a   :  { %415 = vst [vmem:[#allocation2 + $0x8] sm:$0xff] %v257_v47 }
  0x9b   :  { %431 = vst [vmem:[#allocation2 + $0x88] sm:$0xff] %v297_v48 }
  0x9d   :  { %v336_v49 = vpop.f32.mrf.mxu2  ;;  %v376_v50 = vpop.f32.mrf.mxu3 }
  0x9e   :  { %v337_v51 = vadd.f32 %v852_v36, %v336_v49  ;;  %v377_v52 = vadd.f32 %v852_v36, %v376_v50  ;;  %v259_v53 = vpop.f32.mrf.mxu0  ;;  %v299_v54 = vpop.f32.mrf.mxu1 }
  0x9f   :  { %v260_v55 = vadd.f32 %v852_v36, %v259_v53  ;;  %v300_v56 = vadd.f32 %v852_v36, %v299_v54 }
  0xa0   :  { %447 = vst [vmem:[#allocation2 + $0x108] sm:$0xff] %v337_v51 }
  0xa1   :  { %463 = vst [vmem:[#allocation2 + $0x188] sm:$0xff] %v377_v52 }
  0xa2   :  { %416 = vst [vmem:[#allocation2 + $0x10] sm:$0xff] %v260_v55 }
  0xa3   :  { %432 = vst [vmem:[#allocation2 + $0x90] sm:$0xff] %v300_v56 }
  0xa5   :  { %v339_v57 = vpop.f32.mrf.mxu2  ;;  %v379_v58 = vpop.f32.mrf.mxu3 }
  0xa6   :  { %v340_v59 = vadd.f32 %v852_v36, %v339_v57  ;;  %v380_v60 = vadd.f32 %v852_v36, %v379_v58  ;;  %v261_v61 = vpop.f32.mrf.mxu0  ;;  %v301_v62 = vpop.f32.mrf.mxu1 }
  0xa7   :  { %v262_v63 = vadd.f32 %v852_v36, %v261_v61  ;;  %v302_v0 = vadd.f32 %v852_v36, %v301_v62 }
  0xa8   :  { %448 = vst [vmem:[#allocation2 + $0x110] sm:$0xff] %v340_v59 }
  0xa9   :  { %464 = vst [vmem:[#allocation2 + $0x190] sm:$0xff] %v380_v60 }
  0xaa   :  { %417 = vst [vmem:[#allocation2 + $0x18] sm:$0xff] %v262_v63 }
  0xab   :  { %433 = vst [vmem:[#allocation2 + $0x98] sm:$0xff] %v302_v0 }
  0xad   :  { %v341_v1 = vpop.f32.mrf.mxu2  ;;  %v381_v2 = vpop.f32.mrf.mxu3 }
  0xae   :  { %v342_v3 = vadd.f32 %v852_v36, %v341_v1  ;;  %v382_v4 = vadd.f32 %v852_v36, %v381_v2  ;;  %v264_v5 = vpop.f32.mrf.mxu0  ;;  %v304_v6 = vpop.f32.mrf.mxu1 }
  0xaf   :  { %v265_v7 = vadd.f32 %v852_v36, %v264_v5  ;;  %v305_v8 = vadd.f32 %v852_v36, %v304_v6 }
  0xb0   :  { %449 = vst [vmem:[#allocation2 + $0x118] sm:$0xff] %v342_v3 }
  0xb1   :  { %465 = vst [vmem:[#allocation2 + $0x198] sm:$0xff] %v382_v4 }
  0xb2   :  { %418 = vst [vmem:[#allocation2 + $0x20] sm:$0xff] %v265_v7 }
  0xb3   :  { %434 = vst [vmem:[#allocation2 + $0xa0] sm:$0xff] %v305_v8 }
  0xb5   :  { %v344_v9 = vpop.f32.mrf.mxu2  ;;  %v384_v10 = vpop.f32.mrf.mxu3 }
  0xb6   :  { %v345_v11 = vadd.f32 %v852_v36, %v344_v9  ;;  %v385_v12 = vadd.f32 %v852_v36, %v384_v10  ;;  %v266_v13 = vpop.f32.mrf.mxu0  ;;  %v306_v14 = vpop.f32.mrf.mxu1 }
  0xb7   :  { %v267_v15 = vadd.f32 %v852_v36, %v266_v13  ;;  %v307_v16 = vadd.f32 %v852_v36, %v306_v14 }
  0xb8   :  { %450 = vst [vmem:[#allocation2 + $0x120] sm:$0xff] %v345_v11 }
  0xb9   :  { %466 = vst [vmem:[#allocation2 + $0x1a0] sm:$0xff] %v385_v12 }
  0xba   :  { %419 = vst [vmem:[#allocation2 + $0x28] sm:$0xff] %v267_v15 }
  0xbb   :  { %435 = vst [vmem:[#allocation2 + $0xa8] sm:$0xff] %v307_v16 }
  0xbd   :  { %v346_v17 = vpop.f32.mrf.mxu2  ;;  %v386_v18 = vpop.f32.mrf.mxu3 }
  0xbe   :  { %v347_v19 = vadd.f32 %v852_v36, %v346_v17  ;;  %v387_v20 = vadd.f32 %v852_v36, %v386_v18  ;;  %v269_v21 = vpop.f32.mrf.mxu0  ;;  %v309_v22 = vpop.f32.mrf.mxu1 }
  0xbf   :  { %v270_v23 = vadd.f32 %v852_v36, %v269_v21  ;;  %v310_v24 = vadd.f32 %v852_v36, %v309_v22 }
  0xc0   :  { %451 = vst [vmem:[#allocation2 + $0x128] sm:$0xff] %v347_v19 }
  0xc1   :  { %467 = vst [vmem:[#allocation2 + $0x1a8] sm:$0xff] %v387_v20 }
  0xc2   :  { %420 = vst [vmem:[#allocation2 + $0x30] sm:$0xff] %v270_v23 }
  0xc3   :  { %436 = vst [vmem:[#allocation2 + $0xb0] sm:$0xff] %v310_v24 }
  0xc5   :  { %v349_v25 = vpop.f32.mrf.mxu2  ;;  %v389_v26 = vpop.f32.mrf.mxu3 }
  0xc6   :  { %v350_v27 = vadd.f32 %v852_v36, %v349_v25  ;;  %v390_v28 = vadd.f32 %v852_v36, %v389_v26  ;;  %v271_v29 = vpop.f32.mrf.mxu0  ;;  %v311_v30 = vpop.f32.mrf.mxu1 }
  0xc7   :  { %v272_v31 = vadd.f32 %v852_v36, %v271_v29  ;;  %v312_v32 = vadd.f32 %v852_v36, %v311_v30 }
  0xc8   :  { %452 = vst [vmem:[#allocation2 + $0x130] sm:$0xff] %v350_v27 }
  0xc9   :  { %468 = vst [vmem:[#allocation2 + $0x1b0] sm:$0xff] %v390_v28 }
  0xca   :  { %421 = vst [vmem:[#allocation2 + $0x38] sm:$0xff] %v272_v31 }
  0xcb   :  { %437 = vst [vmem:[#allocation2 + $0xb8] sm:$0xff] %v312_v32 }
  0xcd   :  { %v351_v33 = vpop.f32.mrf.mxu2  ;;  %v391_v34 = vpop.f32.mrf.mxu3 }
  0xce   :  { %v352_v35 = vadd.f32 %v852_v36, %v351_v33  ;;  %v392_v37 = vadd.f32 %v852_v36, %v391_v34  ;;  %v274_v38 = vpop.f32.mrf.mxu0  ;;  %v314_v39 = vpop.f32.mrf.mxu1 }
  0xcf   :  { %v275_v40 = vadd.f32 %v852_v36, %v274_v38  ;;  %v315_v41 = vadd.f32 %v852_v36, %v314_v39 }
  0xd0   :  { %453 = vst [vmem:[#allocation2 + $0x138] sm:$0xff] %v352_v35 }
  0xd1   :  { %469 = vst [vmem:[#allocation2 + $0x1b8] sm:$0xff] %v392_v37 }
  0xd2   :  { %422 = vst [vmem:[#allocation2 + $0x40] sm:$0xff] %v275_v40 }
  0xd3   :  { %438 = vst [vmem:[#allocation2 + $0xc0] sm:$0xff] %v315_v41 }
  0xd5   :  { %v354_v42 = vpop.f32.mrf.mxu2  ;;  %v394_v43 = vpop.f32.mrf.mxu3 }
  0xd6   :  { %v355_v44 = vadd.f32 %v852_v36, %v354_v42  ;;  %v395_v45 = vadd.f32 %v852_v36, %v394_v43  ;;  %v276_v46 = vpop.f32.mrf.mxu0  ;;  %v316_v47 = vpop.f32.mrf.mxu1 }
  0xd7   :  { %v277_v48 = vadd.f32 %v852_v36, %v276_v46  ;;  %v317_v49 = vadd.f32 %v852_v36, %v316_v47 }
  0xd8   :  { %454 = vst [vmem:[#allocation2 + $0x140] sm:$0xff] %v355_v44 }
  0xd9   :  { %470 = vst [vmem:[#allocation2 + $0x1c0] sm:$0xff] %v395_v45 }
  0xda   :  { %423 = vst [vmem:[#allocation2 + $0x48] sm:$0xff] %v277_v48 }
  0xdb   :  { %439 = vst [vmem:[#allocation2 + $0xc8] sm:$0xff] %v317_v49 }
  0xdd   :  { %v356_v50 = vpop.f32.mrf.mxu2  ;;  %v396_v51 = vpop.f32.mrf.mxu3 }
  0xde   :  { %v357_v52 = vadd.f32 %v852_v36, %v356_v50  ;;  %v397_v53 = vadd.f32 %v852_v36, %v396_v51  ;;  %v279_v54 = vpop.f32.mrf.mxu0  ;;  %v319_v55 = vpop.f32.mrf.mxu1 }
  0xdf   :  { %v280_v56 = vadd.f32 %v852_v36, %v279_v54  ;;  %v320_v57 = vadd.f32 %v852_v36, %v319_v55 }
  0xe0   :  { %455 = vst [vmem:[#allocation2 + $0x148] sm:$0xff] %v357_v52 }
  0xe1   :  { %471 = vst [vmem:[#allocation2 + $0x1c8] sm:$0xff] %v397_v53 }
  0xe2   :  { %424 = vst [vmem:[#allocation2 + $0x50] sm:$0xff] %v280_v56 }
  0xe3   :  { %440 = vst [vmem:[#allocation2 + $0xd0] sm:$0xff] %v320_v57 }
  0xe5   :  { %v359_v58 = vpop.f32.mrf.mxu2  ;;  %v399_v59 = vpop.f32.mrf.mxu3 }
  0xe6   :  { %v360_v60 = vadd.f32 %v852_v36, %v359_v58  ;;  %v400_v61 = vadd.f32 %v852_v36, %v399_v59  ;;  %v281_v62 = vpop.f32.mrf.mxu0  ;;  %v321_v63 = vpop.f32.mrf.mxu1 }
  0xe7   :  { %v282_v0 = vadd.f32 %v852_v36, %v281_v62  ;;  %v322_v1 = vadd.f32 %v852_v36, %v321_v63 }
  0xe8   :  { %456 = vst [vmem:[#allocation2 + $0x150] sm:$0xff] %v360_v60 }
  0xe9   :  { %472 = vst [vmem:[#allocation2 + $0x1d0] sm:$0xff] %v400_v61 }
  0xea   :  { %425 = vst [vmem:[#allocation2 + $0x58] sm:$0xff] %v282_v0 }
  0xeb   :  { %441 = vst [vmem:[#allocation2 + $0xd8] sm:$0xff] %v322_v1 }
  0xed   :  { %v361_v2 = vpop.f32.mrf.mxu2  ;;  %v401_v3 = vpop.f32.mrf.mxu3 }
  0xee   :  { %v362_v4 = vadd.f32 %v852_v36, %v361_v2  ;;  %v402_v5 = vadd.f32 %v852_v36, %v401_v3  ;;  %v284_v6 = vpop.f32.mrf.mxu0  ;;  %v324_v7 = vpop.f32.mrf.mxu1 }
  0xef   :  { %v285_v8 = vadd.f32 %v852_v36, %v284_v6  ;;  %v325_v9 = vadd.f32 %v852_v36, %v324_v7 }
  0xf0   :  { %457 = vst [vmem:[#allocation2 + $0x158] sm:$0xff] %v362_v4 }
  0xf1   :  { %473 = vst [vmem:[#allocation2 + $0x1d8] sm:$0xff] %v402_v5 }
  0xf2   :  { %426 = vst [vmem:[#allocation2 + $0x60] sm:$0xff] %v285_v8 }
  0xf3   :  { %442 = vst [vmem:[#allocation2 + $0xe0] sm:$0xff] %v325_v9 }
  0xf5   :  { %v364_v10 = vpop.f32.mrf.mxu2  ;;  %v404_v11 = vpop.f32.mrf.mxu3 }
  0xf6   :  { %v365_v12 = vadd.f32 %v852_v36, %v364_v10  ;;  %v405_v13 = vadd.f32 %v852_v36, %v404_v11  ;;  %v286_v14 = vpop.f32.mrf.mxu0  ;;  %v326_v15 = vpop.f32.mrf.mxu1 }
  0xf7   :  { %v287_v16 = vadd.f32 %v852_v36, %v286_v14  ;;  %v327_v17 = vadd.f32 %v852_v36, %v326_v15 }
  0xf8   :  { %458 = vst [vmem:[#allocation2 + $0x160] sm:$0xff] %v365_v12 }
  0xf9   :  { %474 = vst [vmem:[#allocation2 + $0x1e0] sm:$0xff] %v405_v13 }
  0xfa   :  { %427 = vst [vmem:[#allocation2 + $0x68] sm:$0xff] %v287_v16 }
  0xfb   :  { %443 = vst [vmem:[#allocation2 + $0xe8] sm:$0xff] %v327_v17 }
  0xfd   :  { %v366_v18 = vpop.f32.mrf.mxu2  ;;  %v406_v19 = vpop.f32.mrf.mxu3 }
  0xfe   :  { %v367_v20 = vadd.f32 %v852_v36, %v366_v18  ;;  %v407_v21 = vadd.f32 %v852_v36, %v406_v19  ;;  %v289_v22 = vpop.f32.mrf.mxu0  ;;  %v329_v23 = vpop.f32.mrf.mxu1 }
  0xff   :  { %v290_v24 = vadd.f32 %v852_v36, %v289_v22  ;;  %v330_v25 = vadd.f32 %v852_v36, %v329_v23 }
 0x100   :  { %459 = vst [vmem:[#allocation2 + $0x168] sm:$0xff] %v367_v20 }
 0x101   :  { %475 = vst [vmem:[#allocation2 + $0x1e8] sm:$0xff] %v407_v21 }
 0x102   :  { %428 = vst [vmem:[#allocation2 + $0x70] sm:$0xff] %v290_v24 }
 0x103   :  { %444 = vst [vmem:[#allocation2 + $0xf0] sm:$0xff] %v330_v25 }
 0x105   :  { %v369_v26 = vpop.f32.mrf.mxu2  ;;  %v409_v27 = vpop.f32.mrf.mxu3 }
 0x106   :  { %v370_v28 = vadd.f32 %v852_v36, %v369_v26  ;;  %v410_v29 = vadd.f32 %v852_v36, %v409_v27  ;;  %v291_v30 = vpop.f32.mrf.mxu0  ;;  %v331_v31 = vpop.f32.mrf.mxu1 }
 0x107   :  { %v292_v32 = vadd.f32 %v852_v36, %v291_v30  ;;  %v332_v33 = vadd.f32 %v852_v36, %v331_v31 }
 0x108   :  { %460 = vst [vmem:[#allocation2 + $0x170] sm:$0xff] %v370_v28 }
 0x109   :  { %476 = vst [vmem:[#allocation2 + $0x1f0] sm:$0xff] %v410_v29 }
 0x10a   :  { %429 = vst [vmem:[#allocation2 + $0x78] sm:$0xff] %v292_v32 }
 0x10b   :  { %445 = vst [vmem:[#allocation2 + $0xf8] sm:$0xff] %v332_v33 }
 0x10d   :  { %v371_v34 = vpop.f32.mrf.mxu2  ;;  %v411_v35 = vpop.f32.mrf.mxu3 }
 0x10e   :  { %v372_v37 = vadd.f32 %v852_v36, %v371_v34  ;;  %v412_v38 = vadd.f32 %v852_v36, %v411_v35 }
 0x110   :  { %461 = vst [vmem:[#allocation2 + $0x178] sm:$0xff] %v372_v37 }
 0x111   :  { %477 = vst [vmem:[#allocation2 + $0x1f8] sm:$0xff] %v412_v38 }
 0x112   :  { %490 = dma.vmem_to_hbm [thread:$0]  %s483_s2, 8192, %s485_s12, [#allocation3], %s591_s13, %s591_s13, %s592_s14  }
 0x113   :  { %588 = dma.done.wait [#allocation3], 8192  }
 0x114   :  { %589 = vsyncadd [#allocation3], 4294959104 }
 0x115   :  { %495 = vsyncpa [#allocation3], 1 }

</bundles_post_ra>
